<compile_context>
chip_gen: v5e
topology: v5e:2x2
jax: 0.10.0
libtpu: 0.0.40
codegen_flags: <defaults>
</compile_context>

<pallas_src>
import functools

import jax
import jax.numpy as jnp
from jax.experimental import pallas as pl
from jax.experimental.pallas import tpu as pltpu


def _round_up(x, m):
    return (x + m - 1) // m * m


def se_conv_kernel(s_ref, w1t_ref, b1_ref, x_ref, w2t_ref, o_ref):
    # Squeeze 1x1 conv, lane-dense row form: [1, C_se] @ [C_se, C_mid] + [1, C_mid].
    # bf16 operands into the MXU, f32 accumulation.
    pre = jnp.dot(s_ref[...], w1t_ref[...],
                  preferred_element_type=jnp.float32) + b1_ref[...]
    # Sigmoid gate stays in f32 (EUP; v5e has no bf16 VPU/EUP path).
    gate = jax.nn.sigmoid(pre)                                   # (1, C_mid) f32
    # Broadcast multiply over HW rows; upcast bf16 activations to f32 for the gate
    # math, then drop to bf16 for the MXU operands of the excite conv.
    y = (gate * x_ref[...].astype(jnp.float32)).astype(jnp.bfloat16)
    # Excite 1x1 conv: bf16 operands, f32 accumulation, lane-dense store.
    o_ref[...] = jnp.dot(y, w2t_ref[...],
                         preferred_element_type=jnp.float32).astype(o_ref.dtype)


def prepare_weights(w1, b1, w2):
    """One-time weight prep (do at load time, not per forward call)."""
    w1t = jnp.asarray(w1).T.astype(jnp.bfloat16)                 # (C_se, C_mid)  bf16
    b1_row = jnp.asarray(b1).reshape(1, -1).astype(jnp.float32)  # (1, C_mid)     f32
    w2t = jnp.asarray(w2).T.astype(jnp.bfloat16)                 # (C_mid, C_out) bf16
    return w1t, b1_row, w2t


@functools.partial(jax.jit, static_argnames=("tile_n",))
def se_conv_forward(x660, x657, w1t, b1_row, w2t, *, tile_n=None):
    """x660: (1, C_se, 1, 1), x657: (1, C_mid, H, W) -> (1, C_out, H, W).

    tile_n=None -> single grid step (best on single-TC v5e/v6e).
    tile_n=128  -> 128-lane C_out tiles with a "parallel" grid (v7x megacore).
    """
    _, c_se, _, _ = x660.shape
    _, c_mid, H, W = x657.shape
    c_out = w2t.shape[1]
    hw = H * W
    hw_pad = _round_up(hw, 8)            # e.g. 49 -> 56: clean sublane rows
    c_out_pad = _round_up(c_out, 128)    # lane-dense, unmasked output stores
    if tile_n is None:
        tile_n = c_out_pad               # single-step grid by default
    assert c_out_pad % tile_n == 0

    # Squeeze input as a bf16 row vector (tiny).
    s = x660.reshape(1, c_se).astype(jnp.bfloat16)
    # Channels on lanes: (HW, C_mid); cast to bf16 and pad HW in one fused wrapper op.
    xT = x657.reshape(c_mid, hw).T.astype(jnp.bfloat16)
    if hw_pad != hw:
        xT = jnp.pad(xT, ((0, hw_pad - hw), (0, 0)))
    if c_out_pad != c_out:
        w2t = jnp.pad(w2t, ((0, 0), (0, c_out_pad - c_out)))

    n_tiles = c_out_pad // tile_n
    grid = (n_tiles,)

    cost = pl.CostEstimate(
        flops=2 * hw_pad * c_mid * c_out_pad            # excite matmul
        + n_tiles * (2 * c_se * c_mid + hw_pad * c_mid),  # squeeze + gate per step
        transcendentals=n_tiles * c_mid,
        bytes_accessed=(int(w2t.size) * 2 + int(xT.size) * 2 + int(w1t.size) * 2
                        + int(b1_row.size) * 4 + int(s.size) * 2
                        + hw_pad * c_out_pad * 4),
    )

    out = pl.pallas_call(
        se_conv_kernel,
        out_shape=jax.ShapeDtypeStruct((hw_pad, c_out_pad), jnp.float32),
        grid_spec=pltpu.PrefetchScalarGridSpec(
            num_scalar_prefetch=0,
            grid=grid,
            in_specs=[
                pl.BlockSpec((1, c_se), lambda j: (0, 0)),         # s  (bf16 row)
                pl.BlockSpec((c_se, c_mid), lambda j: (0, 0)),     # w1^T (bf16)
                pl.BlockSpec((1, c_mid), lambda j: (0, 0)),        # b1 (f32 row)
                pl.BlockSpec((hw_pad, c_mid), lambda j: (0, 0)),   # x^T (bf16)
                pl.BlockSpec((c_mid, tile_n), lambda j: (0, j)),   # w2^T tile (bf16)
            ],
            out_specs=pl.BlockSpec((hw_pad, tile_n), lambda j: (0, j)),
        ),
        compiler_params=pltpu.CompilerParams(
            dimension_semantics=("parallel",)),
        cost_estimate=cost,
    )(s, w1t, b1_row, xT, w2t)

    if hw_pad != hw:
        out = out[:hw]
    if c_out_pad != c_out:
        out = out[:, :c_out]
    # TODO(synk): if the surrounding graph kept activations channels-last (HW, C),
    # both wrapper transposes (input and this one) would disappear entirely.
    return out.T.reshape(1, c_out, H, W)     # back to NCHW


def reference_forward_f32(x660, x657, w1, b1, w2):
    c_mid = x657.shape[1]
    H, W = x657.shape[2], x657.shape[3]
    s = x660.reshape(-1, 1)
    pre = w1 @ s + b1.reshape(-1, 1)
    gate = jax.nn.sigmoid(pre)
    y = gate * x657.reshape(c_mid, H * W)
    out = w2 @ y
    return out.reshape(1, w2.shape[0], H, W)


def reference_forward_bf16(x660, x657, w1, b1, w2):
    # Matches the kernel numerics: bf16 operands into both matmuls with f32
    # accumulation, f32 sigmoid/gating.
    c_mid = x657.shape[1]
    H, W = x657.shape[2], x657.shape[3]
    s = x660.reshape(1, -1).astype(jnp.bfloat16)
    pre = jnp.dot(s, w1.T.astype(jnp.bfloat16),
                  preferred_element_type=jnp.float32) + b1.reshape(1, -1)
    gate = jax.nn.sigmoid(pre)
    y = (gate * x657.reshape(c_mid, H * W).T).astype(jnp.bfloat16)
    out = jnp.dot(y, w2.T.astype(jnp.bfloat16),
                  preferred_element_type=jnp.float32)
    return out.T.reshape(1, w2.shape[0], H, W)


if __name__ == "__main__":
    # Small shapes consistent with the module structure
    # (original: C_se=96, C_mid=2304, C_out=384, H=W=7)
    C_SE, C_MID, C_OUT, H, W = 32, 256, 128, 7, 7

    key = jax.random.PRNGKey(0)
    k1, k2, k3, k4, k5 = jax.random.split(key, 5)

    # Conv2d 1x1 weights collapse to matrices
    w1 = jax.random.normal(k1, (C_MID, C_SE), dtype=jnp.float32) * 0.1    # conv2d210 weight
    b1 = jax.random.normal(k2, (C_MID,), dtype=jnp.float32) * 0.1         # conv2d210 bias
    w2 = jax.random.normal(k3, (C_OUT, C_MID), dtype=jnp.float32) * 0.05  # conv2d211 weight (no bias)

    # Inputs
    x660 = jax.random.normal(k4, (1, C_SE, 1, 1), dtype=jnp.float32)
    x657 = jax.random.normal(k5, (1, C_MID, H, W), dtype=jnp.float32)

    # One-time weight layout prep (pre-transposed, bf16)
    w1t, b1_row, w2t = prepare_weights(w1, b1, w2)

    out = jax.block_until_ready(se_conv_forward(x660, x657, w1t, b1_row, w2t))
    assert out.shape == (1, C_OUT, H, W), out.shape

    # Tight check vs a reference computed with the same bf16/f32 mix
    ref_bf16 = reference_forward_bf16(x660, x657, w1, b1, w2)
    assert jnp.allclose(out, ref_bf16, atol=5e-3, rtol=5e-3), \
        "mismatch vs bf16-matched reference"

    # Loose check vs the pure-f32 reference (bf16 matmul operands loosen accuracy)
    ref_f32 = reference_forward_f32(x660, x657, w1, b1, w2)
    assert jnp.allclose(out, ref_f32, atol=5e-2, rtol=5e-2), \
        "mismatch vs f32 reference"

    # Also exercise the v7x-style 128-lane tiled "parallel" grid path once.
    out_tiled = jax.block_until_ready(
        se_conv_forward(x660, x657, w1t, b1_row, w2t, tile_n=128))
    assert jnp.allclose(out_tiled, out, atol=1e-5, rtol=1e-5), \
        "tiled grid path disagrees with single-step path"

    print("KERNEL_OK")
</pallas_src>

<mosaic_0001>
module attributes {stable_mosaic.version = 11 : i64} {
  func.func @se_conv_kernel(%arg0: i32, %arg1: memref<1x32xbf16, #tpu.memory_space<vmem>>, %arg2: memref<32x256xbf16, #tpu.memory_space<vmem>>, %arg3: memref<1x256xf32, #tpu.memory_space<vmem>>, %arg4: memref<56x256xbf16, #tpu.memory_space<vmem>>, %arg5: memref<256x128xbf16, #tpu.memory_space<vmem>>, %arg6: memref<56x128xf32, #tpu.memory_space<vmem>>) attributes {dimension_semantics = [#tpu.dimension_semantics<parallel>], iteration_bounds = array<i64: 1>, scalar_prefetch = 0 : i64, scratch_operands = 0 : i64, tpu.core_type = #tpu.core_type<tc>, window_params = [{pipeline_mode = #tpu.pipeline_mode<synchronous>, transform_indices = @transform_0, window_bounds = array<i64: 1, 32>}, {pipeline_mode = #tpu.pipeline_mode<synchronous>, transform_indices = @transform_1, window_bounds = array<i64: 32, 256>}, {pipeline_mode = #tpu.pipeline_mode<synchronous>, transform_indices = @transform_2, window_bounds = array<i64: 1, 256>}, {pipeline_mode = #tpu.pipeline_mode<synchronous>, transform_indices = @transform_3, window_bounds = array<i64: 56, 256>}, {transform_indices = @transform_4, window_bounds = array<i64: 256, 128>}, {transform_indices = @transform_5, window_bounds = array<i64: 56, 128>}]} {
    %c0 = arith.constant 0 : index
    %c0_0 = arith.constant 0 : index
    %0 = vector.load %arg1[%c0, %c0_0] : memref<1x32xbf16, #tpu.memory_space<vmem>>, vector<1x32xbf16>
    %c0_1 = arith.constant 0 : index
    %c0_2 = arith.constant 0 : index
    %1 = vector.load %arg2[%c0_1, %c0_2] : memref<32x256xbf16, #tpu.memory_space<vmem>>, vector<32x256xbf16>
    %cst = arith.constant dense<0.000000e+00> : vector<1x256xf32>
    %2 = tpu.matmul %0, %1, %cst {dimension_numbers = #tpu.dot_dimension_numbers<[1], [0], [0], [1], [0, 0, 1, 1], [], []>} : vector<1x32xbf16>, vector<32x256xbf16>, vector<1x256xf32> -> vector<1x256xf32>
    %c0_3 = arith.constant 0 : index
    %c0_4 = arith.constant 0 : index
    %3 = vector.load %arg3[%c0_3, %c0_4] : memref<1x256xf32, #tpu.memory_space<vmem>>, vector<1x256xf32>
    %4 = arith.addf %2, %3 : vector<1x256xf32>
    %5 = arith.negf %4 : vector<1x256xf32>
    %6 = math.exp %5 : vector<1x256xf32>
    %cst_5 = arith.constant 1.000000e+00 : f32
    %7 = vector.broadcast %cst_5 : f32 to vector<1x256xf32>
    %8 = arith.addf %7, %6 : vector<1x256xf32>
    %9 = arith.divf %7, %8 : vector<1x256xf32>
    %c0_6 = arith.constant 0 : index
    %c0_7 = arith.constant 0 : index
    %10 = vector.load %arg4[%c0_6, %c0_7] : memref<56x256xbf16, #tpu.memory_space<vmem>>, vector<56x256xbf16>
    %11 = arith.extf %10 : vector<56x256xbf16> to vector<56x256xf32>
    %12 = vector.broadcast %9 : vector<1x256xf32> to vector<56x256xf32>
    %13 = arith.mulf %12, %11 : vector<56x256xf32>
    %14 = arith.truncf %13 : vector<56x256xf32> to vector<56x256xbf16>
    %c0_8 = arith.constant 0 : index
    %c0_9 = arith.constant 0 : index
    %15 = vector.load %arg5[%c0_8, %c0_9] : memref<256x128xbf16, #tpu.memory_space<vmem>>, vector<256x128xbf16>
    %cst_10 = arith.constant dense<0.000000e+00> : vector<56x128xf32>
    %16 = tpu.matmul %14, %15, %cst_10 {dimension_numbers = #tpu.dot_dimension_numbers<[1], [0], [0], [1], [0, 0, 1, 1], [], []>} : vector<56x256xbf16>, vector<256x128xbf16>, vector<56x128xf32> -> vector<56x128xf32>
    %c0_11 = arith.constant 0 : index
    %c0_12 = arith.constant 0 : index
    %17 = vector.load %arg6[%c0_11, %c0_12] : memref<56x128xf32, #tpu.memory_space<vmem>>, vector<56x128xf32>
    tpu.vector_store %arg6[%c0_11, %c0_12], %16 {strides = array<i32>} : memref<56x128xf32, #tpu.memory_space<vmem>>, vector<56x128xf32>,
    return
  }
  func.func @transform_0(%arg0: i32) -> (i32, i32) {
    %c0_i32 = arith.constant 0 : i32
    %c0_i32_0 = arith.constant 0 : i32
    %c0_i32_1 = arith.constant 0 : i32
    return %c0_i32, %c0_i32_0 : i32, i32
  }
  func.func @transform_1(%arg0: i32) -> (i32, i32) {
    %c0_i32 = arith.constant 0 : i32
    %c0_i32_0 = arith.constant 0 : i32
    %c0_i32_1 = arith.constant 0 : i32
    return %c0_i32, %c0_i32_0 : i32, i32
  }
  func.func @transform_2(%arg0: i32) -> (i32, i32) {
    %c0_i32 = arith.constant 0 : i32
    %c0_i32_0 = arith.constant 0 : i32
    %c0_i32_1 = arith.constant 0 : i32
    return %c0_i32, %c0_i32_0 : i32, i32
  }
  func.func @transform_3(%arg0: i32) -> (i32, i32) {
    %c0_i32 = arith.constant 0 : i32
    %c0_i32_0 = arith.constant 0 : i32
    %c0_i32_1 = arith.constant 0 : i32
    return %c0_i32, %c0_i32_0 : i32, i32
  }
  func.func @transform_4(%arg0: i32) -> (i32, i32) {
    %c0_i32 = arith.constant 0 : i32
    %c0_i32_0 = arith.constant 0 : i32
    return %c0_i32, %arg0 : i32, i32
  }
  func.func @transform_5(%arg0: i32) -> (i32, i32) {
    %c0_i32 = arith.constant 0 : i32
    %c0_i32_0 = arith.constant 0 : i32
    return %c0_i32, %arg0 : i32, i32
  }
}

</mosaic_0001>

<bundles_post_ra>
// kernel: se_conv_forward.1
= control target key start
LH: loop header
LB: loop body
LE: loop exit
PB: predicated region body
PF: predicated region fallthrough
CT: control target
= control target key end

     0   :  { %vm52_vm0 = vcmask 261120   ;;  %s644_s1 = inlined_call_operand.vmem [shape: bf16[32,256], index: 1, kind: input, shape index: {}]   ;;  %s645_s0 = inlined_call_operand.vmem [shape: bf16[1,32], index: 0, kind: input, shape index: {}]   ;;  %s646_s4 = inlined_call_operand.vmem [shape: bf16[256,128], index: 4, kind: input, shape index: {}]   ;;  %s647_s2 = inlined_call_operand.vmem [shape: f32[1,256], index: 2, kind: input, shape index: {}]   ;;  %s648_s3 = inlined_call_operand.vmem [shape: bf16[56,256], index: 3, kind: input, shape index: {}]   ;;  %s649_s5 = inlined_call_operand.vmem [shape: f32[56,128], index: 5, kind: output, shape index: {}]  }
   0x1   :  { %v370_v0 = vld [vmem:[%s644_s1 + $0x10] sm:$0xf]  ;;  %v447_v1 = vld [vmem:[%s644_s1 + $0x14] sm:$0xf0]  ;;  %v446_v2 = vld [vmem:[%s644_s1 + $0x14] sm:$0xf] }
   0x2   :  { %v371_v3 = vor.u32 %v447_v1, %v370_v0  ;;  %v372_v4 = vld [vmem:[%s644_s1 + $0x18] sm:$0xf0]  ;;  %v362_v5 = vld [vmem:[%s644_s1] sm:$0xf]  ;;  %v445_v6 = vld [vmem:[%s644_s1 + $0x4] sm:$0xf0] }
   0x3   :  { %v375_v7 = vor.u32 %v446_v2, %v372_v4  ;;  %v444_v8 = vld [vmem:[%s644_s1 + $0x4] sm:$0xf]  ;;  %v364_v9 = vld [vmem:[%s644_s1 + $0x8] sm:$0xf0]  ;;  %v363_v10 = vor.u32 %v445_v6, %v362_v5  ;;  %v21_v12 = vld [vmem:[%s645_s0] sm:$0x1] }
   0x4   :  { %62 = vmatpush.bf16.msra.mxu0 %v371_v3  ;;  %v367_v11 = vor.u32 %v444_v8, %v364_v9  ;;  %v455_v13 = vld [vmem:[%s646_s4 + $0x38] sm:$0xff]  ;;  %v454_v15 = vld [vmem:[%s646_s4 + $0x30] sm:$0xff]  ;;  %v453_v17 = vld [vmem:[%s646_s4 + $0x28] sm:$0xff] }
   0x5   :  { %75 = vmatpush.bf16.msra.mxu1 %v375_v7  ;;  %v463_v14 = vld [vmem:[%s646_s4 + $0x78] sm:$0xff]  ;;  %464 = vmatpush.bf16.msra.mxu2 %v455_v13  ;;  %v462_v16 = vld [vmem:[%s646_s4 + $0x70] sm:$0xff]  ;;  %v461_v18 = vld [vmem:[%s646_s4 + $0x68] sm:$0xff] }
   0x6   :  { %472 = vmatpush.bf16.msra.mxu3 %v463_v14  ;;  %v452_v19 = vld [vmem:[%s646_s4 + $0x20] sm:$0xff]  ;;  %v451_v21 = vld [vmem:[%s646_s4 + $0x18] sm:$0xff]  ;;  %v450_v23 = vld [vmem:[%s646_s4 + $0x10] sm:$0xff] }
   0x7   :  { %v460_v20 = vld [vmem:[%s646_s4 + $0x60] sm:$0xff]  ;;  %v459_v22 = vld [vmem:[%s646_s4 + $0x58] sm:$0xff]  ;;  %v458_v24 = vld [vmem:[%s646_s4 + $0x50] sm:$0xff] }
   0x8   :  { %63 = vmatpush.bf16.msra.mxu0 %v363_v10  ;;  %v26_v25 = vld [vmem:[%s647_s2] sm:$0x3]  ;;  %v449_v27 = vld [vmem:[%s646_s4 + $0x8] sm:$0xff]  ;;  %v122_v63 = vld [vmem:[%s648_s3 + $0x10] sm:$0xff] }
   0x9   :  { %76 = vmatpush.bf16.msra.mxu1 %v367_v11  ;;  %465 = vmatpush.bf16.msra.mxu2 %v454_v15  ;;  %v48_v26 = vperm.slane %v26_v25, 0  ;;  %v457_v28 = vld [vmem:[%s646_s4 + $0x48] sm:$0xff]  ;;  %v49_v29 = vperm.slane %v26_v25, 1  ;;  %v448_v31 = vld [vmem:[%s646_s4] sm:$0xff]  ;;  %v123_v3 = vld [vmem:[%s648_s3 + $0x18] sm:$0xff]  ;;  %v132_v10 = vunpack.c.h.bf16 %v122_v63 }
   0xa   :  { %473 = vmatpush.bf16.msra.mxu3 %v462_v16  ;;  %v456_v32 = vld [vmem:[%s646_s4 + $0x40] sm:$0xff]  ;;  %v121_v53 = vld [vmem:[%s648_s3 + $0x8] sm:$0xff] }
   0xb   :  { %376 = vmatmul.msk.bf16.vlgmr.msra.gmra.mxu0 %vm52_vm0, %v21_v12  ;;  %v120_v49 = vld [vmem:[%s648_s3] sm:$0xff]  ;;  %v125_v58 = vld [vmem:[%s648_s3 + $0x28] sm:$0xff]  ;;  %v129_v1 = vunpack.c.l.bf16 %v121_v53  ;;  %v130_v9 = vunpack.c.h.bf16 %v121_v53 }
   0xc   :  { %377 = vmatmul.msk.bf16.vlgmr.msra.gmra.mxu1 %vm52_vm0, %v21_v12  ;;  %293 = vmatpush.bf16.msrb.mxu0 %v455_v13  ;;  %v124_v54 = vld [vmem:[%s648_s3 + $0x20] sm:$0xff]  ;;  %v127_v57 = vunpack.c.l.bf16 %v120_v49  ;;  %v137_v5 = vunpack.c.l.bf16 %v125_v58  ;;  %v128_v6 = vunpack.c.h.bf16 %v120_v49  ;;  %v134_v13 = vunpack.c.h.bf16 %v123_v3 }
   0xd   :  { %321 = vmatpush.bf16.msrb.mxu1 %v463_v14  ;;  %466 = vmatpush.bf16.msra.mxu2 %v453_v17  ;;  %v135_v2 = vunpack.c.l.bf16 %v124_v54 }
   0xe   :  { %474 = vmatpush.bf16.msra.mxu3 %v461_v18 }
  0x10   :  { %294 = vmatpush.bf16.msrb.mxu0 %v454_v15 }
  0x11   :  { %322 = vmatpush.bf16.msrb.mxu1 %v462_v16  ;;  %467 = vmatpush.bf16.msra.mxu2 %v452_v19 }
  0x12   :  { %475 = vmatpush.bf16.msra.mxu3 %v460_v20 }
  0x14   :  { %295 = vmatpush.bf16.msrb.mxu0 %v453_v17 }
  0x15   :  { %323 = vmatpush.bf16.msrb.mxu1 %v461_v18  ;;  %468 = vmatpush.bf16.msra.mxu2 %v451_v21 }
  0x16   :  { %476 = vmatpush.bf16.msra.mxu3 %v459_v22 }
  0x18   :  { %296 = vmatpush.bf16.msrb.mxu0 %v452_v19 }
  0x19   :  { %324 = vmatpush.bf16.msrb.mxu1 %v460_v20  ;;  %469 = vmatpush.bf16.msra.mxu2 %v450_v23 }
  0x1a   :  { %477 = vmatpush.bf16.msra.mxu3 %v458_v24 }
  0x1c   :  { %297 = vmatpush.bf16.msrb.mxu0 %v451_v21 }
  0x1d   :  { %325 = vmatpush.bf16.msrb.mxu1 %v459_v22  ;;  %470 = vmatpush.bf16.msra.mxu2 %v449_v27 }
  0x1e   :  { %478 = vmatpush.bf16.msra.mxu3 %v457_v28 }
  0x20   :  { %298 = vmatpush.bf16.msrb.mxu0 %v450_v23 }
  0x21   :  { %326 = vmatpush.bf16.msrb.mxu1 %v458_v24  ;;  %471 = vmatpush.bf16.msra.mxu2 %v448_v31 }
  0x22   :  { %479 = vmatpush.bf16.msra.mxu3 %v456_v32 }
  0x24   :  { %299 = vmatpush.bf16.msrb.mxu0 %v449_v27 }
  0x25   :  { %327 = vmatpush.bf16.msrb.mxu1 %v457_v28 }
  0x28   :  { %300 = vmatpush.bf16.msrb.mxu0 %v448_v31  ;;  %v133_v31 = vunpack.c.l.bf16 %v123_v3 }
  0x29   :  { %328 = vmatpush.bf16.msrb.mxu1 %v456_v32 }
  0x88   :  { %v65_v30 = vpop.f32.mrf.mxu0 }
  0x89   :  { %v66_v33 = vadd.f32 %v65_v30, %v48_v26  ;;  %v78_v34 = vpop.f32.mrf.mxu1  ;;  %v131_v30 = vunpack.c.l.bf16 %v122_v63 }
  0x8a   :  { %v79_v35 = vadd.f32 %v78_v34, %v49_v29  ;;  %v126_v29 = vld [vmem:[%s648_s3 + $0x30] sm:$0xff]  ;;  %v138_v34 = vunpack.c.h.bf16 %v125_v58 }
  0x8b   :  { %v378_v36 = vmul.f32 -1.442695, %v66_v33  ;;  %v139_v32 = vunpack.c.l.bf16 %v126_v29  ;;  %v136_v33 = vunpack.c.h.bf16 %v124_v54 }
  0x8c   :  { %v379_v37 = vmul.f32 -1.442695, %v79_v35 }
  0x8d   :  { %480 = vpow2.f32 %v378_v36 }
  0x8e   :  { %482 = vpow2.f32 %v379_v37 }
  0x90   :  { %v67_v38 = vpop.f32.mrf.mxu0 }
  0x91   :  { %v80_v39 = vpop.f32.mrf.mxu1 }
  0x93   :  { %v481_v40 = vpop.eup %480 }
  0x94   :  { %v483_v41 = vpop.eup %482  ;;  %v88_v42 = vadd.f32 1.0, %v481_v40 }
  0x95   :  { %v89_v43 = vadd.f32 1.0, %v483_v41 }
  0x96   :  { %484 = vrcp.f32 %v88_v42  ;;  %v101_v47 = vand.u32 2147483648, %v88_v42  ;;  %vm95_vm1 = vweird.f32 %v88_v42  ;;  %v99_v51 = vand.u32 2147483647, %v88_v42 }
  0x97   :  { %486 = vrcp.f32 %v89_v43  ;;  %v116_v56 = vand.u32 2147483648, %v89_v43  ;;  %v114_v62 = vand.u32 2147483647, %v89_v43  ;;  %vm110_vm6 = vweird.f32 %v89_v43 }
  0x98   :  { %v102_v60 = vor.u32 1.1754944e-38, %v101_v47  ;;  %vm100_vm5 = vcmp.eq.f32.partialorder %v99_v51, 8.507059e+37 }
  0x99   :  { %v117_v8 = vor.u32 1.1754944e-38, %v116_v56  ;;  %vm115_vm8 = vcmp.eq.f32.partialorder %v114_v62, 8.507059e+37 }
  0x9c   :  { %v485_v44 = vpop.eup %484 }
  0x9d   :  { %v487_v45 = vpop.eup %486  ;;  %v91_v46 = vmul.f32 %v485_v44, %v88_v42  ;;  %vm96_vm2 = vweird.f32 %v485_v44 }
  0x9e   :  { %v106_v48 = vmul.f32 %v487_v45, %v89_v43  ;;  %vm608_vm3 = vmor %vm95_vm1, %vm96_vm2  ;;  %vm111_vm4 = vweird.f32 %v487_v45  ;;  %v140_v43 = vunpack.c.h.bf16 %v126_v29 }
  0x9f   :  { %v92_v50 = vsub.f32 1.0, %v91_v46  ;;  %vm112_vm7 = vmor %vm110_vm6, %vm111_vm4 }
  0xa0   :  { %v107_v52 = vsub.f32 1.0, %v106_v48 }
  0xa1   :  { %v93_v55 = vmul.f32 %v485_v44, %v92_v50 }
  0xa2   :  { %v108_v61 = vmul.f32 %v487_v45, %v107_v52 }
  0xa3   :  { %v94_v0 = vadd.f32 %v485_v44, %v93_v55 }
  0xa4   :  { %v109_v4 = vadd.f32 %v487_v45, %v108_v61 }
  0xa5   :  { %v98_v7 = vsel %vm608_vm3, %v485_v44, %v94_v0 }
  0xa6   :  { %v103_v11 = vsel %vm100_vm5, %v102_v60, %v98_v7  ;;  %v113_v12 = vsel %vm112_vm7, %v487_v45, %v109_v4 }
  0xa7   :  { %v141_v14 = vperm.slane %v103_v11, 0  ;;  %v118_v15 = vsel %vm115_vm8, %v117_v8, %v113_v12 }
  0xa8   :  { %v142_v16 = vperm.slane %v118_v15, 0 }
  0xa9   :  { %v143_v17 = vmul.f32 %v141_v14, %v127_v57  ;;  %v145_v18 = vmul.f32 %v141_v14, %v129_v1  ;;  %v151_v19 = vmul.f32 %v141_v14, %v135_v2  ;;  %v153_v20 = vmul.f32 %v141_v14, %v137_v5 }
  0xaa   :  { %v144_v21 = vmul.f32 %v142_v16, %v128_v6  ;;  %v146_v22 = vmul.f32 %v142_v16, %v130_v9  ;;  %v148_v23 = vmul.f32 %v142_v16, %v132_v10  ;;  %v150_v24 = vmul.f32 %v142_v16, %v134_v13 }
  0xab   :  { %v157_v25 = vpack.c.bf16 %v145_v18, %v143_v17  ;;  %v161_v26 = vpack.c.bf16 %v153_v20, %v151_v19  ;;  %v147_v35 = vmul.f32 %v141_v14, %v131_v30  ;;  %v149_v36 = vmul.f32 %v141_v14, %v133_v31 }
  0xac   :  { %v158_v27 = vpack.c.bf16 %v146_v22, %v144_v21  ;;  %v160_v28 = vpack.c.bf16 %v150_v24, %v148_v23  ;;  %v155_v37 = vmul.f32 %v141_v14, %v139_v32  ;;  %v152_v38 = vmul.f32 %v142_v16, %v136_v33 }
  0xad   :  { %301 = vmatmul.bf16.vlgmr.msrb.gmra.mxu0 %v157_v25  ;;  %311 = vmatmul.bf16.vlgmr.msra.gmra.mxu2 %v161_v26  ;;  %v154_v39 = vmul.f32 %v142_v16, %v138_v34  ;;  %v159_v40 = vpack.c.bf16 %v149_v36, %v147_v35  ;;  %v156_v44 = vmul.f32 %v142_v16, %v140_v43 }
  0xae   :  { %329 = vmatmul.bf16.vlgmr.msrb.gmra.mxu1 %v158_v27  ;;  %334 = vmatmul.bf16.vlgmr.msra.gmra.mxu3 %v160_v28  ;;  %v163_v41 = vpack.c.bf16 %v155_v37, %v155_v37 }
  0xaf   :  { %v162_v42 = vpack.c.bf16 %v154_v39, %v152_v38  ;;  %v164_v45 = vpack.c.bf16 %v156_v44, %v156_v44 }
  0xbd   :  { %306 = vmatmul.bf16.gmra.mxu0 %v159_v40  ;;  %316 = vmatmul.bf16.gmra.mxu2 %v163_v41 }
  0xbe   :  { %339 = vmatmul.bf16.gmra.mxu3 %v162_v42 }
  0xce   :  { %344 = vmatmul.bf16.gmra.mxu3 %v164_v45 }
 0x12a   :  { %v302_v46 = vpop.f32.mrf.mxu0 }
 0x12b   :  { %v330_v47 = vpop.f32.mrf.mxu1 }
 0x12c   :  { %v331_v48 = vadd.f32 %v330_v47, %v302_v46 }
 0x12e   :  { %349 = vst [vmem:[%s649_s5] sm:$0xff] %v331_v48 }
 0x130   :  { %v312_v49 = vpop.f32.mrf.mxu2 }
 0x131   :  { %v335_v50 = vpop.f32.mrf.mxu3 }
 0x132   :  { %v304_v51 = vpop.f32.mrf.mxu0 }
 0x133   :  { %v332_v52 = vpop.f32.mrf.mxu1 }
 0x134   :  { %v333_v53 = vadd.f32 %v332_v52, %v304_v51 }
 0x136   :  { %350 = vst [vmem:[%s649_s5 + $0x8] sm:$0xff] %v333_v53 }
 0x138   :  { %v314_v54 = vpop.f32.mrf.mxu2 }
 0x139   :  { %v337_v55 = vpop.f32.mrf.mxu3 }
 0x13a   :  { %v307_v56 = vpop.f32.mrf.mxu0 }
 0x13b   :  { %v336_v57 = vadd.f32 %v335_v50, %v307_v56 }
 0x13d   :  { %351 = vst [vmem:[%s649_s5 + $0x10] sm:$0xff] %v336_v57 }
 0x140   :  { %v317_v58 = vpop.f32.mrf.mxu2 }
 0x141   :  { %v340_v59 = vpop.f32.mrf.mxu3 }
 0x142   :  { %v341_v60 = vadd.f32 %v340_v59, %v312_v49  ;;  %v309_v61 = vpop.f32.mrf.mxu0 }
 0x143   :  { %v338_v62 = vadd.f32 %v337_v55, %v309_v61 }
 0x144   :  { %353 = vst [vmem:[%s649_s5 + $0x20] sm:$0xff] %v341_v60 }
 0x145   :  { %352 = vst [vmem:[%s649_s5 + $0x18] sm:$0xff] %v338_v62 }
 0x148   :  { %v319_v63 = vpop.f32.mrf.mxu2 }
 0x149   :  { %v342_v0 = vpop.f32.mrf.mxu3 }
 0x14a   :  { %v343_v1 = vadd.f32 %v342_v0, %v314_v54 }
 0x14c   :  { %354 = vst [vmem:[%s649_s5 + $0x28] sm:$0xff] %v343_v1 }
 0x151   :  { %v345_v2 = vpop.f32.mrf.mxu3 }
 0x152   :  { %v346_v3 = vadd.f32 %v345_v2, %v317_v58 }
 0x154   :  { %355 = vst [vmem:[%s649_s5 + $0x30] sm:$0xff] %v346_v3 }
 0x159   :  { %v347_v4 = vpop.f32.mrf.mxu3 }

</bundles_post_ra>
